<compile_context>
chip_gen: v6e
topology: v6e:2x2x1
jax: 0.10.0
libtpu: 0.0.40
codegen_flags: <defaults>
</compile_context>

<pallas_src>
import functools

import jax
import jax.numpy as jnp
from jax.experimental import pallas as pl
from jax.experimental.pallas import tpu as pltpu

_LANE = 128
_MIB = 1 << 20


def _round_up(v: int, m: int) -> int:
    return ((v + m - 1) // m) * m


def _choose_tiling(n: int):
    """Return (n_pad, block_m, block_k).

    Lane/sublane-aligned tiles; idempotent: _choose_tiling(n_pad)[0] == n_pad.
    """
    n128 = _round_up(max(n, 1), _LANE)
    if n128 <= 1024:
        # Small graphs: contract over the whole padded node dim in one step;
        # split rows in two (when it stays 128-aligned) so the "parallel" row
        # axis has >=2 iterations and covers both v7x TensorCores.
        block_k = n128
        if n128 >= 256 and (n128 // 2) % _LANE == 0:
            block_m = n128 // 2
        else:
            block_m = _LANE
        n_pad = n128
    else:
        # Large graphs: 512-wide tiles amortize the fixed per-grid-step
        # overhead against adj streaming (the dominant HBM traffic).
        block_m = 512
        block_k = 512
        n_pad = _round_up(n128, 512)
    return n_pad, block_m, block_k


def _vmem_limit(buffer_bytes: int) -> int:
    """Scoped-VMEM request sized from actual buffer needs plus headroom,
    kept well under v7x's 64 MiB physical VMEM."""
    return int(min(max(buffer_bytes * 5 // 4 + 4 * _MIB, 16 * _MIB), 48 * _MIB))


def _pad2d(a, rows: int, cols: int):
    return jnp.pad(a, ((0, rows - a.shape[0]), (0, cols - a.shape[1])))


# ---------------------------------------------------------------------------
# Kernels
# ---------------------------------------------------------------------------
def _transform_kernel(h_ref, w_ref, hw_ref):
    """HW tile = H tile @ W  (bf16 x bf16 -> f32 on MXU, stored bf16)."""
    hw_ref[...] = jnp.dot(
        h_ref[...], w_ref[...], preferred_element_type=jnp.float32
    ).astype(hw_ref.dtype)


def _aggregate_kernel(adj_ref, hw_ref, b_ref, out_ref, acc_ref,
                      *, block_k, hw_resident):
    """OUT row-tile = sum_k adj[i, k] @ HW[k]  + b   (f32 VMEM accumulator)."""
    k = pl.program_id(1)

    @pl.when(k == 0)
    def _():
        acc_ref[...] = jnp.zeros_like(acc_ref)

    if hw_resident:
        # HW is fully resident in VMEM (constant index_map); slice the k-th
        # contraction slab out of it with an aligned dynamic slice.
        start = pl.multiple_of(k * block_k, block_k)
        hw_blk = hw_ref[pl.ds(start, block_k), :]
    else:
        hw_blk = hw_ref[...]

    acc_ref[...] += jnp.dot(
        adj_ref[...], hw_blk, preferred_element_type=jnp.float32
    )

    @pl.when(k == pl.num_programs(1) - 1)
    def _():
        out_ref[...] = (acc_ref[...] + b_ref[...]).astype(out_ref.dtype)


# ---------------------------------------------------------------------------
# Per-layer pallas_call wrappers
# ---------------------------------------------------------------------------
def _transform(h, w, block_m):
    n_pad, f_in = h.shape
    f_out = w.shape[1]
    need = (2 * block_m * f_in * 2        # H tiles (double-buffered)
            + 2 * f_in * f_out * 2        # resident W (allow 2 copies)
            + 2 * block_m * f_out * 2)    # out tiles
    return pl.pallas_call(
        _transform_kernel,
        out_shape=jax.ShapeDtypeStruct((n_pad, f_out), jnp.bfloat16),
        grid=(n_pad // block_m,),
        in_specs=[
            pl.BlockSpec((block_m, f_in), lambda i: (i, 0)),
            # Tiny weight: constant index_map -> stays resident, not re-DMA'd.
            pl.BlockSpec((f_in, f_out), lambda i: (0, 0)),
        ],
        out_specs=pl.BlockSpec((block_m, f_out), lambda i: (i, 0)),
        compiler_params=pltpu.CompilerParams(
            dimension_semantics=("parallel",),
            vmem_limit_bytes=_vmem_limit(need),
        ),
    )(h, w)


def _aggregate(adj, hw, b, out_dtype, block_m, block_k):
    n_pad = adj.shape[0]
    f_out = hw.shape[1]
    out_itemsize = jnp.dtype(out_dtype).itemsize

    # Keep HW fully VMEM-resident (DMA'd once, never re-fetched per row tile)
    # whenever it fits comfortably; otherwise stream (block_k, f_out) slabs.
    hw_resident = 2 * n_pad * f_out * 2 <= 16 * _MIB

    need = (2 * block_m * block_k * 2                                   # adj
            + (2 * n_pad * f_out * 2 if hw_resident
               else 2 * block_k * f_out * 2)                            # HW
            + block_m * f_out * 4                                       # acc
            + 2 * block_m * f_out * out_itemsize                        # out
            + 2 * 8 * f_out * 4)                                        # bias

    if hw_resident:
        hw_spec = pl.BlockSpec((n_pad, f_out), lambda i, k: (0, 0))
    else:
        hw_spec = pl.BlockSpec((block_k, f_out), lambda i, k: (k, 0))

    kernel = functools.partial(
        _aggregate_kernel, block_k=block_k, hw_resident=hw_resident)

    return pl.pallas_call(
        kernel,
        out_shape=jax.ShapeDtypeStruct((n_pad, f_out), out_dtype),
        grid=(n_pad // block_m, n_pad // block_k),
        in_specs=[
            pl.BlockSpec((block_m, block_k), lambda i, k: (i, k)),
            hw_spec,
            # Tiny bias: constant index_map -> resident across the whole grid.
            pl.BlockSpec((1, f_out), lambda i, k: (0, 0)),
        ],
        out_specs=pl.BlockSpec((block_m, f_out), lambda i, k: (i, 0)),
        scratch_shapes=[pltpu.VMEM((block_m, f_out), jnp.float32)],
        compiler_params=pltpu.CompilerParams(
            dimension_semantics=("parallel", "arbitrary"),
            vmem_limit_bytes=_vmem_limit(need),
        ),
    )(adj, hw, b)


# ---------------------------------------------------------------------------
# Full 4-layer forward
# ---------------------------------------------------------------------------
def preprocess_adjacency(adj):
    """Pad the (pre-normalized) dense adjacency to the tile size and cast to
    bf16 ONCE, outside the per-call jitted path (it is reused by all 4 layers
    and typically across many forward calls)."""
    n = adj.shape[0]
    n_pad, _, _ = _choose_tiling(n)
    return _pad2d(adj, n_pad, n_pad).astype(jnp.bfloat16)


@jax.jit
def gcn_forward(x, adj_p, params):
    """x: [N, in_dim] f32 (unpadded).  adj_p: output of preprocess_adjacency.
    params: dict with w1..w4 ([Fin,Fout] f32) and b1..b4 ([1,Fout] f32)."""
    n = x.shape[0]
    out_dim = params["w4"].shape[1]
    n_pad = adj_p.shape[0]
    _, block_m, block_k = _choose_tiling(n_pad)   # idempotent on padded size

    # Zero padding is inert for the valid region:
    #  * padded feature columns stay exactly 0 through every layer (padded W
    #    output-columns and padded bias columns are 0),
    #  * padded node rows pick up at most the broadcast bias, but the padded
    #    adj *columns* are 0, so padded rows never contaminate valid rows.
    h = _pad2d(x, n_pad, _round_up(x.shape[1], _LANE)).astype(jnp.bfloat16)

    for i in range(1, 5):
        w = params[f"w{i}"]
        b = params[f"b{i}"]
        f_in_pad = _round_up(w.shape[0], _LANE)
        f_out_pad = _round_up(w.shape[1], _LANE)
        w_p = _pad2d(w, f_in_pad, f_out_pad).astype(jnp.bfloat16)
        b_p = _pad2d(b, 1, f_out_pad).astype(jnp.float32)

        hw = _transform(h, w_p, block_m)                       # H @ W   (bf16)
        out_dtype = jnp.float32 if i == 4 else jnp.bfloat16
        h = _aggregate(adj_p, hw, b_p, out_dtype, block_m, block_k)  # adj@HW+b

    return h[:n, :out_dim]


# ---------------------------------------------------------------------------
# Params + references + self-test
# ---------------------------------------------------------------------------
def init_gcn_params(key, in_dim, out_dim):
    """Deterministic kaiming-normal-like init (matches _initialize_weights)."""
    dims = [in_dim, in_dim * 2, in_dim * 4, in_dim * 2, out_dim]
    params = {}
    keys = jax.random.split(key, 8)
    for i in range(4):
        fan_in, fan_out = dims[i], dims[i + 1]
        std = jnp.sqrt(2.0 / fan_in)
        params[f"w{i + 1}"] = std * jax.random.normal(
            keys[2 * i], (fan_in, fan_out), dtype=jnp.float32)
        # PyG initializes the bias to zero; use a small non-zero bias here so
        # the bias path of the kernel is actually exercised numerically.
        params[f"b{i + 1}"] = 0.1 * jax.random.normal(
            keys[2 * i + 1], (1, fan_out), dtype=jnp.float32)
    return params


def _reference_forward_f32(x, adj, params):
    h = x
    for i in range(1, 5):
        h = adj @ (h @ params[f"w{i}"]) + params[f"b{i}"]
    return h


def _reference_forward_bf16(x, adj, params):
    """Mirrors the kernel's precision: bf16 operands, f32 accumulation."""
    adj_bf = adj.astype(jnp.bfloat16)
    h = x.astype(jnp.bfloat16)
    for i in range(1, 5):
        w = params[f"w{i}"].astype(jnp.bfloat16)
        hw = jnp.dot(h, w, preferred_element_type=jnp.float32).astype(jnp.bfloat16)
        h = jnp.dot(adj_bf, hw, preferred_element_type=jnp.float32) + params[f"b{i}"]
        if i < 4:
            h = h.astype(jnp.bfloat16)
    return h.astype(jnp.float32)


if __name__ == "__main__":
    key = jax.random.PRNGKey(0)
    k_x, k_adj, k_p = jax.random.split(key, 3)

    N_NODES = 200   # pads to 256 -> 2 row tiles x 1 contraction tile
    IN_DIM = 8
    OUT_DIM = 8

    # Node features.
    x = jax.random.normal(k_x, (N_NODES, IN_DIM), dtype=jnp.float32)

    # Dense symmetric adjacency with self-loops, D^-1/2 (A+I) D^-1/2 normalized
    # (normalization done by the caller, standard dense-GCN convention).
    a_raw = (jax.random.uniform(k_adj, (N_NODES, N_NODES)) > 0.9).astype(jnp.float32)
    a_sym = jnp.minimum(
        jnp.maximum(a_raw, a_raw.T) + jnp.eye(N_NODES, dtype=jnp.float32), 1.0)
    deg = jnp.sum(a_sym, axis=1)
    d_inv_sqrt = 1.0 / jnp.sqrt(deg)
    adj = a_sym * d_inv_sqrt[:, None] * d_inv_sqrt[None, :]

    params = init_gcn_params(k_p, IN_DIM, OUT_DIM)

    # Pad + bf16-cast the adjacency once, outside the jitted per-call path.
    adj_p = jax.block_until_ready(preprocess_adjacency(adj))

    out = jax.block_until_ready(gcn_forward(x, adj_p, params))
    assert out.shape == (N_NODES, OUT_DIM)

    # Primary check: matches a JAX reference with the same bf16/f32 precision.
    ref_bf16 = _reference_forward_bf16(x, adj, params)
    assert jnp.allclose(out, ref_bf16, atol=1e-2, rtol=1e-2), \
        "mismatch vs bf16 reference"

    # Sanity check: close to the pure-f32 reference (bf16 quantization only).
    ref_f32 = _reference_forward_f32(x, adj, params)
    rel_err = jnp.max(jnp.abs(out - ref_f32)) / (jnp.max(jnp.abs(ref_f32)) + 1e-6)
    assert rel_err < 0.05, f"f32 sanity check failed, rel_err={rel_err}"

    print("KERNEL_OK")
</pallas_src>

<mosaic_0001>
module attributes {stable_mosaic.version = 11 : i64} {
  func.func @_transform_kernel(%arg0: i32, %arg1: memref<128x128xbf16, #tpu.memory_space<vmem>>, %arg2: memref<128x128xbf16, #tpu.memory_space<vmem>>, %arg3: memref<128x128xbf16, #tpu.memory_space<vmem>>) attributes {dimension_semantics = [#tpu.dimension_semantics<parallel>], iteration_bounds = array<i64: 2>, scalar_prefetch = 0 : i64, scratch_operands = 0 : i64, tpu.core_type = #tpu.core_type<tc>, window_params = [{transform_indices = @transform_0, window_bounds = array<i64: 128, 128>}, {pipeline_mode = #tpu.pipeline_mode<synchronous>, transform_indices = @transform_1, window_bounds = array<i64: 128, 128>}, {transform_indices = @transform_2, window_bounds = array<i64: 128, 128>}]} {
    %c0 = arith.constant 0 : index
    %c0_0 = arith.constant 0 : index
    %0 = vector.load %arg1[%c0, %c0_0] : memref<128x128xbf16, #tpu.memory_space<vmem>>, vector<128x128xbf16>
    %c0_1 = arith.constant 0 : index
    %c0_2 = arith.constant 0 : index
    %1 = vector.load %arg2[%c0_1, %c0_2] : memref<128x128xbf16, #tpu.memory_space<vmem>>, vector<128x128xbf16>
    %cst = arith.constant dense<0.000000e+00> : vector<128x128xf32>
    %2 = tpu.matmul %0, %1, %cst {dimension_numbers = #tpu.dot_dimension_numbers<[1], [0], [0], [1], [0, 0, 1, 1], [], []>} : vector<128x128xbf16>, vector<128x128xbf16>, vector<128x128xf32> -> vector<128x128xf32>
    %3 = arith.truncf %2 : vector<128x128xf32> to vector<128x128xbf16>
    %c0_3 = arith.constant 0 : index
    %c0_4 = arith.constant 0 : index
    %4 = vector.load %arg3[%c0_3, %c0_4] : memref<128x128xbf16, #tpu.memory_space<vmem>>, vector<128x128xbf16>
    tpu.vector_store %arg3[%c0_3, %c0_4], %3 {strides = array<i32>} : memref<128x128xbf16, #tpu.memory_space<vmem>>, vector<128x128xbf16>,
    return
  }
  func.func @transform_0(%arg0: i32) -> (i32, i32) {
    %c0_i32 = arith.constant 0 : i32
    %c0_i32_0 = arith.constant 0 : i32
    return %arg0, %c0_i32 : i32, i32
  }
  func.func @transform_1(%arg0: i32) -> (i32, i32) {
    %c0_i32 = arith.constant 0 : i32
    %c0_i32_0 = arith.constant 0 : i32
    %c0_i32_1 = arith.constant 0 : i32
    return %c0_i32, %c0_i32_0 : i32, i32
  }
  func.func @transform_2(%arg0: i32) -> (i32, i32) {
    %c0_i32 = arith.constant 0 : i32
    %c0_i32_0 = arith.constant 0 : i32
    return %arg0, %c0_i32 : i32, i32
  }
}

module attributes {stable_mosaic.version = 11 : i64} {
  func.func @_aggregate_kernel(%arg0: i32, %arg1: i32, %arg2: memref<128x256xbf16, #tpu.memory_space<vmem>>, %arg3: memref<256x128xbf16, #tpu.memory_space<vmem>>, %arg4: memref<1x128xf32, #tpu.memory_space<vmem>>, %arg5: memref<128x128xbf16, #tpu.memory_space<vmem>>, %arg6: memref<128x128xf32, #tpu.memory_space<vmem>>) attributes {dimension_semantics = [#tpu.dimension_semantics<parallel>, #tpu.dimension_semantics<arbitrary>], iteration_bounds = array<i64: 2, 1>, scalar_prefetch = 0 : i64, scratch_operands = 1 : i64, tpu.core_type = #tpu.core_type<tc>, window_params = [{transform_indices = @transform_0, window_bounds = array<i64: 128, 256>}, {pipeline_mode = #tpu.pipeline_mode<synchronous>, transform_indices = @transform_1, window_bounds = array<i64: 256, 128>}, {pipeline_mode = #tpu.pipeline_mode<synchronous>, transform_indices = @transform_2, window_bounds = array<i64: 1, 128>}, {transform_indices = @transform_3, window_bounds = array<i64: 128, 128>}]} {
    %c0_i32 = arith.constant 0 : i32
    %0 = arith.cmpi eq, %arg1, %c0_i32 : i32
    %1 = arith.extui %0 : i1 to i32
    %c0_i32_0 = arith.constant 0 : i32
    %2 = arith.cmpi ne, %1, %c0_i32_0 : i32
    scf.if %2 {
      %cst_9 = arith.constant 0.000000e+00 : f32
      %15 = vector.broadcast %cst_9 : f32 to vector<128x128xf32>
      %c0_10 = arith.constant 0 : index
      %c0_11 = arith.constant 0 : index
      %16 = vector.load %arg6[%c0_10, %c0_11] : memref<128x128xf32, #tpu.memory_space<vmem>>, vector<128x128xf32>
      tpu.vector_store %arg6[%c0_10, %c0_11], %15 {strides = array<i32>} : memref<128x128xf32, #tpu.memory_space<vmem>>, vector<128x128xf32>,
    } else {
    }
    %c256_i32 = arith.constant 256 : i32
    %3 = arith.muli %arg1, %c256_i32 : i32
    %4 = tpu.assume_multiple %3, 256 : i32
    %5 = arith.index_cast %4 : i32 to index
    %c0 = arith.constant 0 : index
    %6 = vector.load %arg3[%5, %c0] : memref<256x128xbf16, #tpu.memory_space<vmem>>, vector<256x128xbf16>
    %c0_1 = arith.constant 0 : index
    %c0_2 = arith.constant 0 : index
    %7 = vector.load %arg6[%c0_1, %c0_2] : memref<128x128xf32, #tpu.memory_space<vmem>>, vector<128x128xf32>
    %c0_3 = arith.constant 0 : index
    %c0_4 = arith.constant 0 : index
    %8 = vector.load %arg2[%c0_3, %c0_4] : memref<128x256xbf16, #tpu.memory_space<vmem>>, vector<128x256xbf16>
    %cst = arith.constant dense<0.000000e+00> : vector<128x128xf32>
    %9 = tpu.matmul %8, %6, %cst {dimension_numbers = #tpu.dot_dimension_numbers<[1], [0], [0], [1], [0, 0, 1, 1], [], []>} : vector<128x256xbf16>, vector<256x128xbf16>, vector<128x128xf32> -> vector<128x128xf32>
    %10 = arith.addf %7, %9 : vector<128x128xf32>
    %c0_5 = arith.constant 0 : index
    %c0_6 = arith.constant 0 : index
    %11 = vector.load %arg6[%c0_5, %c0_6] : memref<128x128xf32, #tpu.memory_space<vmem>>, vector<128x128xf32>
    tpu.vector_store %arg6[%c0_5, %c0_6], %10 {strides = array<i32>} : memref<128x128xf32, #tpu.memory_space<vmem>>, vector<128x128xf32>,
    %c0_i32_7 = arith.constant 0 : i32
    %12 = arith.cmpi eq, %arg1, %c0_i32_7 : i32
    %13 = arith.extui %12 : i1 to i32
    %c0_i32_8 = arith.constant 0 : i32
    %14 = arith.cmpi ne, %13, %c0_i32_8 : i32
    scf.if %14 {
      %c0_9 = arith.constant 0 : index
      %c0_10 = arith.constant 0 : index
      %15 = vector.load %arg6[%c0_9, %c0_10] : memref<128x128xf32, #tpu.memory_space<vmem>>, vector<128x128xf32>
      %c0_11 = arith.constant 0 : index
      %c0_12 = arith.constant 0 : index
      %16 = vector.load %arg4[%c0_11, %c0_12] : memref<1x128xf32, #tpu.memory_space<vmem>>, vector<1x128xf32>
      %17 = vector.broadcast %16 : vector<1x128xf32> to vector<128x128xf32>
      %18 = arith.addf %15, %17 : vector<128x128xf32>
      %19 = arith.truncf %18 : vector<128x128xf32> to vector<128x128xbf16>
      %c0_13 = arith.constant 0 : index
      %c0_14 = arith.constant 0 : index
      %20 = vector.load %arg5[%c0_13, %c0_14] : memref<128x128xbf16, #tpu.memory_space<vmem>>, vector<128x128xbf16>
      tpu.vector_store %arg5[%c0_13, %c0_14], %19 {strides = array<i32>} : memref<128x128xbf16, #tpu.memory_space<vmem>>, vector<128x128xbf16>,
    } else {
    }
    return
  }
  func.func @transform_0(%arg0: i32, %arg1: i32) -> (i32, i32) {
    %c0_i32 = arith.constant 0 : i32
    return %arg0, %arg1 : i32, i32
  }
  func.func @transform_1(%arg0: i32, %arg1: i32) -> (i32, i32) {
    %c0_i32 = arith.constant 0 : i32
    %c0_i32_0 = arith.constant 0 : i32
    %c0_i32_1 = arith.constant 0 : i32
    return %c0_i32, %c0_i32_0 : i32, i32
  }
  func.func @transform_2(%arg0: i32, %arg1: i32) -> (i32, i32) {
    %c0_i32 = arith.constant 0 : i32
    %c0_i32_0 = arith.constant 0 : i32
    %c0_i32_1 = arith.constant 0 : i32
    return %c0_i32, %c0_i32_0 : i32, i32
  }
  func.func @transform_3(%arg0: i32, %arg1: i32) -> (i32, i32) {
    %c0_i32 = arith.constant 0 : i32
    %c0_i32_0 = arith.constant 0 : i32
    return %arg0, %c0_i32 : i32, i32
  }
}

module attributes {stable_mosaic.version = 11 : i64} {
  func.func @_aggregate_kernel(%arg0: i32, %arg1: i32, %arg2: memref<128x256xbf16, #tpu.memory_space<vmem>>, %arg3: memref<256x128xbf16, #tpu.memory_space<vmem>>, %arg4: memref<1x128xf32, #tpu.memory_space<vmem>>, %arg5: memref<128x128xf32, #tpu.memory_space<vmem>>, %arg6: memref<128x128xf32, #tpu.memory_space<vmem>>) attributes {dimension_semantics = [#tpu.dimension_semantics<parallel>, #tpu.dimension_semantics<arbitrary>], iteration_bounds = array<i64: 2, 1>, scalar_prefetch = 0 : i64, scratch_operands = 1 : i64, tpu.core_type = #tpu.core_type<tc>, window_params = [{transform_indices = @transform_0, window_bounds = array<i64: 128, 256>}, {pipeline_mode = #tpu.pipeline_mode<synchronous>, transform_indices = @transform_1, window_bounds = array<i64: 256, 128>}, {pipeline_mode = #tpu.pipeline_mode<synchronous>, transform_indices = @transform_2, window_bounds = array<i64: 1, 128>}, {transform_indices = @transform_3, window_bounds = array<i64: 128, 128>}]} {
    %c0_i32 = arith.constant 0 : i32
    %0 = arith.cmpi eq, %arg1, %c0_i32 : i32
    %1 = arith.extui %0 : i1 to i32
    %c0_i32_0 = arith.constant 0 : i32
    %2 = arith.cmpi ne, %1, %c0_i32_0 : i32
    scf.if %2 {
      %cst_9 = arith.constant 0.000000e+00 : f32
      %15 = vector.broadcast %cst_9 : f32 to vector<128x128xf32>
      %c0_10 = arith.constant 0 : index
      %c0_11 = arith.constant 0 : index
      %16 = vector.load %arg6[%c0_10, %c0_11] : memref<128x128xf32, #tpu.memory_space<vmem>>, vector<128x128xf32>
      tpu.vector_store %arg6[%c0_10, %c0_11], %15 {strides = array<i32>} : memref<128x128xf32, #tpu.memory_space<vmem>>, vector<128x128xf32>,
    } else {
    }
    %c256_i32 = arith.constant 256 : i32
    %3 = arith.muli %arg1, %c256_i32 : i32
    %4 = tpu.assume_multiple %3, 256 : i32
    %5 = arith.index_cast %4 : i32 to index
    %c0 = arith.constant 0 : index
    %6 = vector.load %arg3[%5, %c0] : memref<256x128xbf16, #tpu.memory_space<vmem>>, vector<256x128xbf16>
    %c0_1 = arith.constant 0 : index
    %c0_2 = arith.constant 0 : index
    %7 = vector.load %arg6[%c0_1, %c0_2] : memref<128x128xf32, #tpu.memory_space<vmem>>, vector<128x128xf32>
    %c0_3 = arith.constant 0 : index
    %c0_4 = arith.constant 0 : index
    %8 = vector.load %arg2[%c0_3, %c0_4] : memref<128x256xbf16, #tpu.memory_space<vmem>>, vector<128x256xbf16>
    %cst = arith.constant dense<0.000000e+00> : vector<128x128xf32>
    %9 = tpu.matmul %8, %6, %cst {dimension_numbers = #tpu.dot_dimension_numbers<[1], [0], [0], [1], [0, 0, 1, 1], [], []>} : vector<128x256xbf16>, vector<256x128xbf16>, vector<128x128xf32> -> vector<128x128xf32>
    %10 = arith.addf %7, %9 : vector<128x128xf32>
    %c0_5 = arith.constant 0 : index
    %c0_6 = arith.constant 0 : index
    %11 = vector.load %arg6[%c0_5, %c0_6] : memref<128x128xf32, #tpu.memory_space<vmem>>, vector<128x128xf32>
    tpu.vector_store %arg6[%c0_5, %c0_6], %10 {strides = array<i32>} : memref<128x128xf32, #tpu.memory_space<vmem>>, vector<128x128xf32>,
    %c0_i32_7 = arith.constant 0 : i32
    %12 = arith.cmpi eq, %arg1, %c0_i32_7 : i32
    %13 = arith.extui %12 : i1 to i32
    %c0_i32_8 = arith.constant 0 : i32
    %14 = arith.cmpi ne, %13, %c0_i32_8 : i32
    scf.if %14 {
      %c0_9 = arith.constant 0 : index
      %c0_10 = arith.constant 0 : index
      %15 = vector.load %arg6[%c0_9, %c0_10] : memref<128x128xf32, #tpu.memory_space<vmem>>, vector<128x128xf32>
      %c0_11 = arith.constant 0 : index
      %c0_12 = arith.constant 0 : index
      %16 = vector.load %arg4[%c0_11, %c0_12] : memref<1x128xf32, #tpu.memory_space<vmem>>, vector<1x128xf32>
      %17 = vector.broadcast %16 : vector<1x128xf32> to vector<128x128xf32>
      %18 = arith.addf %15, %17 : vector<128x128xf32>
      %c0_13 = arith.constant 0 : index
      %c0_14 = arith.constant 0 : index
      %19 = vector.load %arg5[%c0_13, %c0_14] : memref<128x128xf32, #tpu.memory_space<vmem>>, vector<128x128xf32>
      tpu.vector_store %arg5[%c0_13, %c0_14], %18 {strides = array<i32>} : memref<128x128xf32, #tpu.memory_space<vmem>>, vector<128x128xf32>,
    } else {
    }
    return
  }
  func.func @transform_0(%arg0: i32, %arg1: i32) -> (i32, i32) {
    %c0_i32 = arith.constant 0 : i32
    return %arg0, %arg1 : i32, i32
  }
  func.func @transform_1(%arg0: i32, %arg1: i32) -> (i32, i32) {
    %c0_i32 = arith.constant 0 : i32
    %c0_i32_0 = arith.constant 0 : i32
    %c0_i32_1 = arith.constant 0 : i32
    return %c0_i32, %c0_i32_0 : i32, i32
  }
  func.func @transform_2(%arg0: i32, %arg1: i32) -> (i32, i32) {
    %c0_i32 = arith.constant 0 : i32
    %c0_i32_0 = arith.constant 0 : i32
    %c0_i32_1 = arith.constant 0 : i32
    return %c0_i32, %c0_i32_0 : i32, i32
  }
  func.func @transform_3(%arg0: i32, %arg1: i32) -> (i32, i32) {
    %c0_i32 = arith.constant 0 : i32
    %c0_i32_0 = arith.constant 0 : i32
    return %arg0, %c0_i32 : i32, i32
  }
}

</mosaic_0001>

<bundles_post_ra>
// kernel: gcn_forward.8
= control target key start
LH: loop header
LB: loop body
LE: loop exit
PB: predicated region body
PF: predicated region fallthrough
CT: control target
= control target key end

     0   :  { %s726_s9 = smov 0   ;;  %s784_s0 = inlined_call_operand.vmem [shape: bf16[256,128], index: 0, kind: input, shape index: {}]   ;;  %s785_s1 = inlined_call_operand.vmem [shape: bf16[128,128], index: 1, kind: input, shape index: {}]   ;;  %s786_s2 = inlined_call_operand.vmem [shape: bf16[256,128], index: 2, kind: output, shape index: {}]  }
   0x1 LB: > { %s509_s10 = sadd.s32 4294967295, %s709_s9   ;;  %p513_p0 = scmp.ge.s32.totalorder %s709_s9, 1  ;;  %s709_s9 = sphi %s726_s9, %s12_s9  }
   0x2   : > { %p113_p1 = scmp.lt.s32.totalorder %s709_s9, 3 }
   0x4   : > { %p114_p2 = pnand %p513_p0, %p113_p1 }
   0x5   : > { %s514_s13 = sshll.u32 (!%p114_p2), %s509_s10, 4 }
   0x6   : > { %117 = sbr.rel (%p114_p2) target bundleno = 254 (0xfe), region = 28  ;;  %p136_p3 = scmp.lt.s32.totalorder (!%p114_p2), %s514_s13, 31 }
   0xb   : > { %v687_v0 = vld [vmem:[%s785_s1 + $0x38] sm:$0xff]   ;;  %v688_v1 = vld [vmem:[%s785_s1 + $0x30] sm:$0xff]   ;;  %s788_s13 = smov (!%p136_p3, %s514_s13), 31  ;;  %v689_v2 = vld [vmem:[%s785_s1 + $0x28] sm:$0xff]  }
   0xc   : > { %631 = vmatprep.subr.bf16.mxu0 %v687_v0  ;;  %663 = vmatprep.subr.bf16.mxu1 %v687_v0  ;;  %s515_s18 = sshll.u32 %s788_s13, 2  ;;  %v690_v3 = vld [vmem:[%s785_s1 + $0x20] sm:$0xff]   ;;  %v691_v6 = vld [vmem:[%s785_s1 + $0x18] sm:$0xff]   ;;  %v692_v7 = vld [vmem:[%s785_s1 + $0x10] sm:$0xff]  }
   0xd   : > { %632 = vmatpush3.bf16.msra.mxu0 %v687_v0  ;;  %671 = vmatpush3.bf16.msra.mxu1 %v687_v0  ;;  %s751_s21 = scalar_lea.vmem %s784_s0, %s515_s18  ;;  %v693_v8 = vld [vmem:[%s785_s1 + $0x8] sm:$0xff]   ;;  %v694_v9 = vld [vmem:[%s785_s1] sm:$0xff]   ;;  %s145_s6 = scalar_lea.vmem %s786_s2, %s515_s18 }
   0xe   : > { %633 = vmatprep.subr.bf16.mxu0 %v688_v1  ;;  %664 = vmatprep.subr.bf16.mxu1 %v688_v1  ;;  %v695_v4 = vld [vmem:[%s751_s21] sm:$0xff]   ;;  %v697_v10 = vld [vmem:[%s751_s21 + $0x8] sm:$0xff]   ;;  %v699_v12 = vld [vmem:[%s751_s21 + $0x10] sm:$0xff]  }
   0xf   : > { %v696_v5 = vld [vmem:[%s751_s21 + $0x20] sm:$0xff]   ;;  %647 = vmatprep.mubr.bf16.mxu0 %v695_v4  ;;  %v698_v11 = vld [vmem:[%s751_s21 + $0x28] sm:$0xff]   ;;  %v700_v13 = vld [vmem:[%s751_s21 + $0x30] sm:$0xff]  }
  0x10   : > { %655 = vmatprep.mubr.bf16.mxu1 %v696_v5  ;;  %v701_v14 = vld [vmem:[%s751_s21 + $0x18] sm:$0xff]  }
  0x11   : > { %634 = vmatpush3.bf16.msra.mxu0 %v688_v1  ;;  %672 = vmatpush3.bf16.msra.mxu1 %v688_v1  ;;  %v702_v15 = vld [vmem:[%s751_s21 + $0x38] sm:$0xff]  }
  0x12   : > { %635 = vmatprep.subr.bf16.mxu0 %v689_v2  ;;  %665 = vmatprep.subr.bf16.mxu1 %v689_v2 }
  0x15   : > { %636 = vmatpush3.bf16.msra.mxu0 %v689_v2  ;;  %673 = vmatpush3.bf16.msra.mxu1 %v689_v2 }
  0x16   : > { %637 = vmatprep.subr.bf16.mxu0 %v690_v3  ;;  %666 = vmatprep.subr.bf16.mxu1 %v690_v3 }
  0x19   : > { %638 = vmatpush3.bf16.msra.mxu0 %v690_v3  ;;  %674 = vmatpush3.bf16.msra.mxu1 %v690_v3 }
  0x1a   : > { %639 = vmatprep.subr.bf16.mxu0 %v691_v6  ;;  %667 = vmatprep.subr.bf16.mxu1 %v691_v6 }
  0x1d   : > { %640 = vmatpush3.bf16.msra.mxu0 %v691_v6  ;;  %675 = vmatpush3.bf16.msra.mxu1 %v691_v6 }
  0x1e   : > { %641 = vmatprep.subr.bf16.mxu0 %v692_v7  ;;  %668 = vmatprep.subr.bf16.mxu1 %v692_v7 }
  0x21   : > { %642 = vmatpush3.bf16.msra.mxu0 %v692_v7  ;;  %676 = vmatpush3.bf16.msra.mxu1 %v692_v7 }
  0x22   : > { %643 = vmatprep.subr.bf16.mxu0 %v693_v8  ;;  %669 = vmatprep.subr.bf16.mxu1 %v693_v8 }
  0x25   : > { %644 = vmatpush3.bf16.msra.mxu0 %v693_v8  ;;  %677 = vmatpush3.bf16.msra.mxu1 %v693_v8 }
  0x26   : > { %645 = vmatprep.subr.bf16.mxu0 %v694_v9  ;;  %670 = vmatprep.subr.bf16.mxu1 %v694_v9 }
  0x29   : > { %646 = vmatpush3.bf16.msra.mxu0 %v694_v9  ;;  %678 = vmatpush3.bf16.msra.mxu1 %v694_v9 }
  0x2c   : > { %648 = vmatmul.mubr.bf16.vlgmr.msra.gmra.mxu0 %v697_v10  ;;  %656 = vmatmul.mubr.bf16.vlgmr.msra.gmra.mxu1 %v698_v11 }
  0x2d   : > { %651 = vmatprep.mubr.bf16.mxu0 %v699_v12  ;;  %659 = vmatprep.mubr.bf16.mxu1 %v700_v13 }
  0x34   : > { %652 = vmatmul.mubr.bf16.gmra.mxu0 %v701_v14  ;;  %660 = vmatmul.mubr.bf16.gmra.mxu1 %v702_v15 }
  0xec   : > { %v649_v16 = vpop.f32.mrf.mxu0  ;;  %v657_v17 = vpop.f32.mrf.mxu1 }
  0xee   : > { %v310_v18 = vpop.f32.mrf.mxu0  ;;  %v342_v19 = vpop.f32.mrf.mxu1 }
  0xf0   : > { %v650_v20 = vpop.f32.mrf.mxu0  ;;  %v658_v21 = vpop.f32.mrf.mxu1 }
  0xf1   : > { %v576_v22 = vpack.c.bf16 %v650_v20, %v649_v16  ;;  %v596_v23 = vpack.c.bf16 %v658_v21, %v657_v17 }
  0xf2   : > { %v313_v24 = vpop.f32.mrf.mxu0  ;;  %v345_v25 = vpop.f32.mrf.mxu1 }
  0xf3   : > { %608 = vst [vmem:[%s145_s6 + $0x8] sm:$0xff] %v576_v22   ;;  %612 = vst [vmem:[%s145_s6 + $0x28] sm:$0xff] %v596_v23   ;;  %v571_v26 = vpack.c.bf16 %v313_v24, %v310_v18  ;;  %v591_v27 = vpack.c.bf16 %v345_v25, %v342_v19 }
  0xf4   : > { %v653_v28 = vpop.f32.mrf.mxu0  ;;  %v661_v29 = vpop.f32.mrf.mxu1 }
  0xf5   : > { %572 = vst [vmem:[%s145_s6] sm:$0xff] %v571_v26   ;;  %611 = vst [vmem:[%s145_s6 + $0x20] sm:$0xff] %v591_v27  }
  0xf6   : > { %v326_v30 = vpop.f32.mrf.mxu0  ;;  %v358_v31 = vpop.f32.mrf.mxu1 }
  0xf8   : > { %v654_v32 = vpop.f32.mrf.mxu0  ;;  %v662_v33 = vpop.f32.mrf.mxu1 }
  0xf9   : > { %v586_v34 = vpack.c.bf16 %v654_v32, %v653_v28  ;;  %v606_v35 = vpack.c.bf16 %v662_v33, %v661_v29 }
  0xfa   : > { %v329_v36 = vpop.f32.mrf.mxu0  ;;  %v361_v37 = vpop.f32.mrf.mxu1 }
  0xfb   : > { %610 = vst [vmem:[%s145_s6 + $0x18] sm:$0xff] %v586_v34   ;;  %614 = vst [vmem:[%s145_s6 + $0x38] sm:$0xff] %v606_v35   ;;  %v581_v38 = vpack.c.bf16 %v329_v36, %v326_v30  ;;  %v601_v39 = vpack.c.bf16 %v361_v37, %v358_v31 }
  0xfd   : > { %609 = vst [vmem:[%s145_s6 + $0x10] sm:$0xff] %v581_v38   ;;  %613 = vst [vmem:[%s145_s6 + $0x30] sm:$0xff] %v601_v39  }
  0xfe PF: > { %s12_s9 = sadd.s32 1, %s709_s9  }
  0xff   : > { %p9_p4 = scmp.ge.s32.totalorder %s12_s9, 4  }
 0x101   :  { %11 = sbr.rel (!%p9_p4) target bundleno = 1 (0x1), region = 58 }

// kernel: gcn_forward.9
= control target key start
LH: loop header
LB: loop body
LE: loop exit
PB: predicated region body
PF: predicated region fallthrough
CT: control target
= control target key end

     0   :  { %s1108_s12 = smov 0   ;;  %s1110_s13 = smov 0   ;;  %s1242_s0 = inlined_call_operand.vmem [shape: bf16[256,256], index: 0, kind: input, shape index: {}]   ;;  %s1243_s1 = inlined_call_operand.vmem [shape: bf16[256,128], index: 1, kind: input, shape index: {}]   ;;  %s1244_s2 = inlined_call_operand.vmem [shape: f32[1,128], index: 2, kind: input, shape index: {}]   ;;  %s1245_s3 = inlined_call_operand.vmem [shape: bf16[256,128], index: 3, kind: output, shape index: {}]  }
   0x1   :  { %s1112_s14 = smov 0  }
   0x2 LB: > { %s25_s15 = sadd.s32 1, %s1082_s13  ;;  %p799_p0 = scmp.ge.s32.totalorder %s1086_s14, 1  ;;  %s1086_s14 = sphi %s1112_s14, %s13_s14   ;;  %s1082_s13 = sphi %s1110_s13, %s1247_s13   ;;  %s1078_s12 = sphi %s1108_s12, %s1246_s12  }
   0x3   : > { %p27_p1 = scmp.ge.s32.totalorder %s25_s15, 2  ;;  %p158_p2 = scmp.lt.s32.totalorder %s1086_s14, 3 }
   0x5   : > { %s1249_s15 = smov (%p27_p1, %s25_s15), 0  ;;  %p159_p3 = pnand %p799_p0, %p158_p2 }
   0x6   : > { %s800_s18 = sshll.u32 (!%p159_p3), %s1078_s12, 4 }
   0x7   : > { %162 = sbr.rel (%p159_p3) target bundleno = 275 (0x113), region = 32  ;;  %p189_p4 = scmp.lt.s32.totalorder (!%p159_p3), %s800_s18, 31 }
   0xc   : > { %v1024_v0 = vld [vmem:[%s1243_s1 + $0x78] sm:$0xff]   ;;  %v1026_v2 = vld [vmem:[%s1243_s1 + $0x70] sm:$0xff]   ;;  %v1028_v4 = vld [vmem:[%s1243_s1 + $0x68] sm:$0xff]   ;;  %s1251_s18 = smov (!%p189_p4, %s800_s18), 31 }
   0xd   : > { %v1025_v1 = vld [vmem:[%s1243_s1 + $0x38] sm:$0xff]   ;;  %920 = vmatprep.subr.bf16.mxu0 %v1024_v0  ;;  %984 = vmatprep.subr.bf16.mxu1 %v1024_v0  ;;  %v1027_v3 = vld [vmem:[%s1243_s1 + $0x30] sm:$0xff]   ;;  %v1029_v5 = vld [vmem:[%s1243_s1 + $0x28] sm:$0xff]   ;;  %s856_s6 = sshll.u32 %s1251_s18, 3  ;;  %s804_s5 = sshll.u32 %s1251_s18, 2 }
   0xe   : > { %921 = vmatpush3.bf16.msra.mxu0 %v1025_v1  ;;  %992 = vmatpush3.bf16.msra.mxu1 %v1025_v1  ;;  %v1030_v6 = vld [vmem:[%s1243_s1 + $0x60] sm:$0xff]   ;;  %v1032_v8 = vld [vmem:[%s1243_s1 + $0x58] sm:$0xff]   ;;  %s1159_s11 = scalar_lea.vmem %s1242_s0, %s856_s6  ;;  %v1034_v10 = vld [vmem:[%s1243_s1 + $0x50] sm:$0xff]   ;;  %s1211_s8 = scalar_lea.vmem %s1245_s3, %s804_s5 }
   0xf   : > { %922 = vmatprep.subr.bf16.mxu0 %v1026_v2  ;;  %985 = vmatprep.subr.bf16.mxu1 %v1026_v2  ;;  %v1031_v7 = vld [vmem:[%s1243_s1 + $0x20] sm:$0xff]   ;;  %v1033_v9 = vld [vmem:[%s1243_s1 + $0x18] sm:$0xff]   ;;  %v1035_v13 = vld [vmem:[%s1243_s1 + $0x10] sm:$0xff]  }
  0x10   : > { %v1042_v11 = vld [vmem:[%s1159_s11 + $0x4] ss:$8 sps:$4 sm:$0xff]   ;;  %v1040_v18 = vld [vmem:[%s1159_s11] ss:$8 sps:$4 sm:$0xff]   ;;  %v1046_v20 = vld [vmem:[%s1159_s11 + $0x14] ss:$8 sps:$4 sm:$0xff]  }
  0x11   : > { %v1045_v12 = vld [vmem:[%s1159_s11 + $0x44] ss:$8 sps:$4 sm:$0xff]   ;;  %503 = vmatprep.mubr.bf16.mxu0 %v1042_v11  ;;  %v1043_v19 = vld [vmem:[%s1159_s11 + $0x40] ss:$8 sps:$4 sm:$0xff]   ;;  %v1048_v21 = vld [vmem:[%s1159_s11 + $0x54] ss:$8 sps:$4 sm:$0xff]  }
  0x12   : > { %923 = vmatpush3.bf16.msra.mxu0 %v1027_v3  ;;  %993 = vmatpush3.bf16.msra.mxu1 %v1027_v3  ;;  %v1036_v14 = vld [vmem:[%s1243_s1 + $0x48] sm:$0xff]   ;;  %v1038_v16 = vld [vmem:[%s1243_s1 + $0x40] sm:$0xff]   ;;  %v1050_v22 = vld [vmem:[%s1159_s11 + $0x10] ss:$8 sps:$4 sm:$0xff]  }
  0x13   : > { %924 = vmatprep.subr.bf16.mxu0 %v1028_v4  ;;  %986 = vmatprep.subr.bf16.mxu1 %v1028_v4  ;;  %v1037_v15 = vld [vmem:[%s1243_s1 + $0x8] sm:$0xff]   ;;  %v1039_v17 = vld [vmem:[%s1243_s1] sm:$0xff]   ;;  %v1051_v23 = vld [vmem:[%s1159_s11 + $0x50] ss:$8 sps:$4 sm:$0xff]  }
  0x14   : > { %535 = vmatprep.mubr.bf16.mxu1 %v1045_v12  ;;  %v1052_v24 = vld [vmem:[%s1159_s11 + $0x24] ss:$8 sps:$4 sm:$0xff]   ;;  %v1056_v26 = vld [vmem:[%s1159_s11 + $0x20] ss:$8 sps:$4 sm:$0xff]   ;;  %v1058_v28 = vld [vmem:[%s1159_s11 + $0x34] ss:$8 sps:$4 sm:$0xff]  }
  0x15   : > { %v1054_v25 = vld [vmem:[%s1159_s11 + $0x64] ss:$8 sps:$4 sm:$0xff]   ;;  %v1057_v27 = vld [vmem:[%s1159_s11 + $0x60] ss:$8 sps:$4 sm:$0xff]   ;;  %v1060_v29 = vld [vmem:[%s1159_s11 + $0x74] ss:$8 sps:$4 sm:$0xff]  }
  0x16   : > { %925 = vmatpush3.bf16.msra.mxu0 %v1029_v5  ;;  %994 = vmatpush3.bf16.msra.mxu1 %v1029_v5  ;;  %v1062_v30 = vld [vmem:[%s1159_s11 + $0x30] ss:$8 sps:$4 sm:$0xff]   ;;  %v1201_v40 = vld [vmem:[%s1244_s2] ss:$0 sm:$0xff] }
  0x17   : > { %926 = vmatprep.subr.bf16.mxu0 %v1030_v6  ;;  %987 = vmatprep.subr.bf16.mxu1 %v1030_v6  ;;  %v1063_v31 = vld [vmem:[%s1159_s11 + $0x70] ss:$8 sps:$4 sm:$0xff]  }
  0x1a   : > { %927 = vmatpush3.bf16.msra.mxu0 %v1031_v7  ;;  %995 = vmatpush3.bf16.msra.mxu1 %v1031_v7 }
  0x1b   : > { %928 = vmatprep.subr.bf16.mxu0 %v1032_v8  ;;  %988 = vmatprep.subr.bf16.mxu1 %v1032_v8 }
  0x1e   : > { %929 = vmatpush3.bf16.msra.mxu0 %v1033_v9  ;;  %996 = vmatpush3.bf16.msra.mxu1 %v1033_v9 }
  0x1f   : > { %930 = vmatprep.subr.bf16.mxu0 %v1034_v10  ;;  %989 = vmatprep.subr.bf16.mxu1 %v1034_v10 }
  0x22   : > { %931 = vmatpush3.bf16.msra.mxu0 %v1035_v13  ;;  %997 = vmatpush3.bf16.msra.mxu1 %v1035_v13 }
  0x23   : > { %932 = vmatprep.subr.bf16.mxu0 %v1036_v14  ;;  %990 = vmatprep.subr.bf16.mxu1 %v1036_v14 }
  0x26   : > { %933 = vmatpush3.bf16.msra.mxu0 %v1037_v15  ;;  %998 = vmatpush3.bf16.msra.mxu1 %v1037_v15 }
  0x27   : > { %934 = vmatprep.subr.bf16.mxu0 %v1038_v16  ;;  %991 = vmatprep.subr.bf16.mxu1 %v1038_v16 }
  0x2a   : > { %935 = vmatpush3.bf16.msra.mxu0 %v1039_v17  ;;  %999 = vmatpush3.bf16.msra.mxu1 %v1039_v17 }
  0x2d   : > { %504 = vmatmul.mubr.bf16.vlgmr.msra.gmra.mxu0 %v1040_v18  ;;  %536 = vmatmul.mubr.bf16.vlgmr.msra.gmra.mxu1 %v1043_v19 }
  0x2e   : > { %511 = vmatprep.mubr.bf16.mxu0 %v1046_v20  ;;  %543 = vmatprep.mubr.bf16.mxu1 %v1048_v21 }
  0x35   : > { %512 = vmatmul.mubr.bf16.gmra.mxu0 %v1050_v22  ;;  %544 = vmatmul.mubr.bf16.gmra.mxu1 %v1051_v23 }
  0x36   : > { %519 = vmatprep.mubr.bf16.mxu0 %v1052_v24  ;;  %551 = vmatprep.mubr.bf16.mxu1 %v1054_v25 }
  0x3d   : > { %520 = vmatmul.mubr.bf16.gmra.mxu0 %v1056_v26  ;;  %552 = vmatmul.mubr.bf16.gmra.mxu1 %v1057_v27 }
  0x3e   : > { %527 = vmatprep.mubr.bf16.mxu0 %v1058_v28  ;;  %559 = vmatprep.mubr.bf16.mxu1 %v1060_v29 }
  0x45   : > { %528 = vmatmul.mubr.bf16.gmra.mxu0 %v1062_v30  ;;  %560 = vmatmul.mubr.bf16.gmra.mxu1 %v1063_v31 }
  0xed   : > { %v936_v32 = vpop.f32.mrf.mxu0  ;;  %v960_v33 = vpop.f32.mrf.mxu1 }
  0xef   : > { %v937_v34 = vpop.f32.mrf.mxu0  ;;  %v961_v35 = vpop.f32.mrf.mxu1 }
  0xf0   : > { %v938_v38 = vadd.f32 %v937_v34, %v936_v32  ;;  %v962_v39 = vadd.f32 %v961_v35, %v960_v33 }
  0xf1   : > { %v939_v36 = vpop.f32.mrf.mxu0  ;;  %v963_v37 = vpop.f32.mrf.mxu1 }
  0xf2   : > { %v626_v47 = vadd.f32 %v938_v38, %v1201_v40  ;;  %v634_v48 = vadd.f32 %v962_v39, %v1201_v40 }
  0xf3   : > { %v940_v41 = vpop.f32.mrf.mxu0  ;;  %v964_v42 = vpop.f32.mrf.mxu1 }
  0xf4   : > { %v941_v43 = vadd.f32 %v940_v41, %v939_v36  ;;  %v965_v44 = vadd.f32 %v964_v42, %v963_v37 }
  0xf5   : > { %v942_v45 = vpop.f32.mrf.mxu0  ;;  %v966_v46 = vpop.f32.mrf.mxu1 }
  0xf6   : > { %v627_v49 = vadd.f32 %v941_v43, %v1201_v40  ;;  %v635_v50 = vadd.f32 %v965_v44, %v1201_v40 }
  0xf7   : > { %v943_v51 = vpop.f32.mrf.mxu0  ;;  %v967_v52 = vpop.f32.mrf.mxu1 }
  0xf8   : > { %v876_v53 = vpack.c.bf16 %v627_v49, %v626_v47  ;;  %v896_v54 = vpack.c.bf16 %v635_v50, %v634_v48  ;;  %v944_v57 = vadd.f32 %v943_v51, %v942_v45  ;;  %v968_v58 = vadd.f32 %v967_v52, %v966_v46 }
  0xf9   : > { %v945_v55 = vpop.f32.mrf.mxu0  ;;  %v969_v56 = vpop.f32.mrf.mxu1 }
  0xfa   : > { %877 = vst [vmem:[%s1211_s8] sm:$0xff] %v876_v53   ;;  %916 = vst [vmem:[%s1211_s8 + $0x20] sm:$0xff] %v896_v54   ;;  %v628_v1 = vadd.f32 %v944_v57, %v1201_v40  ;;  %v636_v2 = vadd.f32 %v968_v58, %v1201_v40 }
  0xfb   : > { %v946_v59 = vpop.f32.mrf.mxu0  ;;  %v970_v60 = vpop.f32.mrf.mxu1 }
  0xfc   : > { %v947_v61 = vadd.f32 %v946_v59, %v945_v55  ;;  %v971_v62 = vadd.f32 %v970_v60, %v969_v56 }
  0xfd   : > { %v948_v63 = vpop.f32.mrf.mxu0  ;;  %v972_v0 = vpop.f32.mrf.mxu1 }
  0xfe   : > { %v629_v3 = vadd.f32 %v947_v61, %v1201_v40  ;;  %v637_v4 = vadd.f32 %v971_v62, %v1201_v40 }
  0xff   : > { %v949_v5 = vpop.f32.mrf.mxu0  ;;  %v973_v6 = vpop.f32.mrf.mxu1 }
 0x100   : > { %v881_v7 = vpack.c.bf16 %v629_v3, %v628_v1  ;;  %v901_v8 = vpack.c.bf16 %v637_v4, %v636_v2  ;;  %v950_v11 = vadd.f32 %v949_v5, %v948_v63  ;;  %v974_v12 = vadd.f32 %v973_v6, %v972_v0 }
 0x101   : > { %v951_v9 = vpop.f32.mrf.mxu0  ;;  %v975_v10 = vpop.f32.mrf.mxu1 }
 0x102   : > { %913 = vst [vmem:[%s1211_s8 + $0x8] sm:$0xff] %v881_v7   ;;  %917 = vst [vmem:[%s1211_s8 + $0x28] sm:$0xff] %v901_v8   ;;  %v630_v19 = vadd.f32 %v950_v11, %v1201_v40  ;;  %v638_v20 = vadd.f32 %v974_v12, %v1201_v40 }
 0x103   : > { %v952_v13 = vpop.f32.mrf.mxu0  ;;  %v976_v14 = vpop.f32.mrf.mxu1 }
 0x104   : > { %v953_v15 = vadd.f32 %v952_v13, %v951_v9  ;;  %v977_v16 = vadd.f32 %v976_v14, %v975_v10 }
 0x105   : > { %v954_v17 = vpop.f32.mrf.mxu0  ;;  %v978_v18 = vpop.f32.mrf.mxu1 }
 0x106   : > { %v631_v21 = vadd.f32 %v953_v15, %v1201_v40  ;;  %v639_v22 = vadd.f32 %v977_v16, %v1201_v40 }
 0x107   : > { %v955_v23 = vpop.f32.mrf.mxu0  ;;  %v979_v24 = vpop.f32.mrf.mxu1 }
 0x108   : > { %v886_v25 = vpack.c.bf16 %v631_v21, %v630_v19  ;;  %v906_v26 = vpack.c.bf16 %v639_v22, %v638_v20  ;;  %v956_v29 = vadd.f32 %v955_v23, %v954_v17  ;;  %v980_v30 = vadd.f32 %v979_v24, %v978_v18 }
 0x109   : > { %v957_v27 = vpop.f32.mrf.mxu0  ;;  %v981_v28 = vpop.f32.mrf.mxu1 }
 0x10a   : > { %914 = vst [vmem:[%s1211_s8 + $0x10] sm:$0xff] %v886_v25   ;;  %918 = vst [vmem:[%s1211_s8 + $0x30] sm:$0xff] %v906_v26   ;;  %v632_v35 = vadd.f32 %v956_v29, %v1201_v40  ;;  %v640_v36 = vadd.f32 %v980_v30, %v1201_v40 }
 0x10b   : > { %v958_v31 = vpop.f32.mrf.mxu0  ;;  %v982_v32 = vpop.f32.mrf.mxu1 }
 0x10c   : > { %v959_v33 = vadd.f32 %v958_v31, %v957_v27  ;;  %v983_v34 = vadd.f32 %v982_v32, %v981_v28 }
 0x10e   : > { %v633_v37 = vadd.f32 %v959_v33, %v1201_v40  ;;  %v641_v38 = vadd.f32 %v983_v34, %v1201_v40 }
 0x110   : > { %v891_v39 = vpack.c.bf16 %v633_v37, %v632_v35  ;;  %v911_v41 = vpack.c.bf16 %v641_v38, %v640_v36 }
 0x112   : > { %915 = vst [vmem:[%s1211_s8 + $0x18] sm:$0xff] %v891_v39   ;;  %919 = vst [vmem:[%s1211_s8 + $0x38] sm:$0xff] %v911_v41  }
 0x113 PF: > { %s13_s14 = sadd.s32 1, %s1086_s14   ;;  %s1246_s12 = smov %s1082_s13 }
 0x114   : > { %p10_p5 = scmp.ge.s32.totalorder %s13_s14, 4   ;;  %s1247_s13 = smov %s1249_s15 }
 0x116   :  { %12 = sbr.rel (!%p10_p5) target bundleno = 2 (0x2), region = 71 }

// kernel: gcn_forward.15
= control target key start
LH: loop header
LB: loop body
LE: loop exit
PB: predicated region body
PF: predicated region fallthrough
CT: control target
= control target key end

     0   :  { %s965_s12 = smov 0   ;;  %s967_s13 = smov 0   ;;  %s1110_s0 = inlined_call_operand.vmem [shape: bf16[256,256], index: 0, kind: input, shape index: {}]   ;;  %s1111_s1 = inlined_call_operand.vmem [shape: bf16[256,128], index: 1, kind: input, shape index: {}]   ;;  %s1112_s2 = inlined_call_operand.vmem [shape: f32[1,128], index: 2, kind: input, shape index: {}]   ;;  %s1113_s3 = inlined_call_operand.vmem [shape: f32[256,128], index: 3, kind: output, shape index: {}]  }
   0x1   :  { %s969_s14 = smov 0  }
   0x2 LB: > { %s25_s15 = sadd.s32 1, %s939_s13  ;;  %p735_p0 = scmp.ge.s32.totalorder %s943_s14, 1  ;;  %s943_s14 = sphi %s969_s14, %s13_s14   ;;  %s939_s13 = sphi %s967_s13, %s1115_s13   ;;  %s935_s12 = sphi %s965_s12, %s1114_s12  }
   0x3   : > { %p27_p1 = scmp.ge.s32.totalorder %s25_s15, 2  ;;  %p158_p2 = scmp.lt.s32.totalorder %s943_s14, 3 }
   0x5   : > { %s1117_s15 = smov (%p27_p1, %s25_s15), 0  ;;  %p159_p3 = pnand %p735_p0, %p158_p2 }
   0x6   : > { %s736_s18 = sshll.u32 (!%p159_p3), %s935_s12, 4 }
   0x7   : > { %162 = sbr.rel (%p159_p3) target bundleno = 273 (0x111), region = 32  ;;  %p189_p4 = scmp.lt.s32.totalorder (!%p159_p3), %s736_s18, 31 }
   0xc   : > { %v881_v0 = vld [vmem:[%s1111_s1 + $0x78] sm:$0xff]   ;;  %v883_v2 = vld [vmem:[%s1111_s1 + $0x70] sm:$0xff]   ;;  %v885_v4 = vld [vmem:[%s1111_s1 + $0x68] sm:$0xff]   ;;  %s1119_s18 = smov (!%p189_p4, %s736_s18), 31 }
   0xd   : > { %v882_v1 = vld [vmem:[%s1111_s1 + $0x38] sm:$0xff]   ;;  %777 = vmatprep.subr.bf16.mxu0 %v881_v0  ;;  %841 = vmatprep.subr.bf16.mxu1 %v881_v0  ;;  %v884_v3 = vld [vmem:[%s1111_s1 + $0x30] sm:$0xff]   ;;  %v886_v5 = vld [vmem:[%s1111_s1 + $0x28] sm:$0xff]   ;;  %s776_s6 = sshll.u32 %s1119_s18, 3 }
   0xe   : > { %778 = vmatpush3.bf16.msra.mxu0 %v882_v1  ;;  %849 = vmatpush3.bf16.msra.mxu1 %v882_v1  ;;  %v887_v6 = vld [vmem:[%s1111_s1 + $0x60] sm:$0xff]   ;;  %v889_v8 = vld [vmem:[%s1111_s1 + $0x58] sm:$0xff]   ;;  %s1018_s11 = scalar_lea.vmem %s1110_s0, %s776_s6  ;;  %v891_v10 = vld [vmem:[%s1111_s1 + $0x50] sm:$0xff]   ;;  %s1067_s8 = scalar_lea.vmem %s1113_s3, %s776_s6 }
   0xf   : > { %779 = vmatprep.subr.bf16.mxu0 %v883_v2  ;;  %842 = vmatprep.subr.bf16.mxu1 %v883_v2  ;;  %v888_v7 = vld [vmem:[%s1111_s1 + $0x20] sm:$0xff]   ;;  %v890_v9 = vld [vmem:[%s1111_s1 + $0x18] sm:$0xff]   ;;  %v892_v13 = vld [vmem:[%s1111_s1 + $0x10] sm:$0xff]  }
  0x10   : > { %v899_v11 = vld [vmem:[%s1018_s11 + $0x4] ss:$8 sps:$4 sm:$0xff]   ;;  %v897_v18 = vld [vmem:[%s1018_s11] ss:$8 sps:$4 sm:$0xff]   ;;  %v903_v20 = vld [vmem:[%s1018_s11 + $0x14] ss:$8 sps:$4 sm:$0xff]  }
  0x11   : > { %v902_v12 = vld [vmem:[%s1018_s11 + $0x44] ss:$8 sps:$4 sm:$0xff]   ;;  %503 = vmatprep.mubr.bf16.mxu0 %v899_v11  ;;  %v900_v19 = vld [vmem:[%s1018_s11 + $0x40] ss:$8 sps:$4 sm:$0xff]   ;;  %v905_v21 = vld [vmem:[%s1018_s11 + $0x54] ss:$8 sps:$4 sm:$0xff]  }
  0x12   : > { %780 = vmatpush3.bf16.msra.mxu0 %v884_v3  ;;  %850 = vmatpush3.bf16.msra.mxu1 %v884_v3  ;;  %v893_v14 = vld [vmem:[%s1111_s1 + $0x48] sm:$0xff]   ;;  %v895_v16 = vld [vmem:[%s1111_s1 + $0x40] sm:$0xff]   ;;  %v907_v22 = vld [vmem:[%s1018_s11 + $0x10] ss:$8 sps:$4 sm:$0xff]  }
  0x13   : > { %781 = vmatprep.subr.bf16.mxu0 %v885_v4  ;;  %843 = vmatprep.subr.bf16.mxu1 %v885_v4  ;;  %v894_v15 = vld [vmem:[%s1111_s1 + $0x8] sm:$0xff]   ;;  %v896_v17 = vld [vmem:[%s1111_s1] sm:$0xff]   ;;  %v908_v23 = vld [vmem:[%s1018_s11 + $0x50] ss:$8 sps:$4 sm:$0xff]  }
  0x14   : > { %535 = vmatprep.mubr.bf16.mxu1 %v902_v12  ;;  %v909_v24 = vld [vmem:[%s1018_s11 + $0x24] ss:$8 sps:$4 sm:$0xff]   ;;  %v913_v26 = vld [vmem:[%s1018_s11 + $0x20] ss:$8 sps:$4 sm:$0xff]   ;;  %v915_v28 = vld [vmem:[%s1018_s11 + $0x34] ss:$8 sps:$4 sm:$0xff]  }
  0x15   : > { %v911_v25 = vld [vmem:[%s1018_s11 + $0x64] ss:$8 sps:$4 sm:$0xff]   ;;  %v914_v27 = vld [vmem:[%s1018_s11 + $0x60] ss:$8 sps:$4 sm:$0xff]   ;;  %v917_v29 = vld [vmem:[%s1018_s11 + $0x74] ss:$8 sps:$4 sm:$0xff]  }
  0x16   : > { %782 = vmatpush3.bf16.msra.mxu0 %v886_v5  ;;  %851 = vmatpush3.bf16.msra.mxu1 %v886_v5  ;;  %v919_v30 = vld [vmem:[%s1018_s11 + $0x30] ss:$8 sps:$4 sm:$0xff]   ;;  %v1060_v35 = vld [vmem:[%s1112_s2] ss:$0 sm:$0xff] }
  0x17   : > { %783 = vmatprep.subr.bf16.mxu0 %v887_v6  ;;  %844 = vmatprep.subr.bf16.mxu1 %v887_v6  ;;  %v920_v31 = vld [vmem:[%s1018_s11 + $0x70] ss:$8 sps:$4 sm:$0xff]  }
  0x1a   : > { %784 = vmatpush3.bf16.msra.mxu0 %v888_v7  ;;  %852 = vmatpush3.bf16.msra.mxu1 %v888_v7 }
  0x1b   : > { %785 = vmatprep.subr.bf16.mxu0 %v889_v8  ;;  %845 = vmatprep.subr.bf16.mxu1 %v889_v8 }
  0x1e   : > { %786 = vmatpush3.bf16.msra.mxu0 %v890_v9  ;;  %853 = vmatpush3.bf16.msra.mxu1 %v890_v9 }
  0x1f   : > { %787 = vmatprep.subr.bf16.mxu0 %v891_v10  ;;  %846 = vmatprep.subr.bf16.mxu1 %v891_v10 }
  0x22   : > { %788 = vmatpush3.bf16.msra.mxu0 %v892_v13  ;;  %854 = vmatpush3.bf16.msra.mxu1 %v892_v13 }
  0x23   : > { %789 = vmatprep.subr.bf16.mxu0 %v893_v14  ;;  %847 = vmatprep.subr.bf16.mxu1 %v893_v14 }
  0x26   : > { %790 = vmatpush3.bf16.msra.mxu0 %v894_v15  ;;  %855 = vmatpush3.bf16.msra.mxu1 %v894_v15 }
  0x27   : > { %791 = vmatprep.subr.bf16.mxu0 %v895_v16  ;;  %848 = vmatprep.subr.bf16.mxu1 %v895_v16 }
  0x2a   : > { %792 = vmatpush3.bf16.msra.mxu0 %v896_v17  ;;  %856 = vmatpush3.bf16.msra.mxu1 %v896_v17 }
  0x2d   : > { %504 = vmatmul.mubr.bf16.vlgmr.msra.gmra.mxu0 %v897_v18  ;;  %536 = vmatmul.mubr.bf16.vlgmr.msra.gmra.mxu1 %v900_v19 }
  0x2e   : > { %511 = vmatprep.mubr.bf16.mxu0 %v903_v20  ;;  %543 = vmatprep.mubr.bf16.mxu1 %v905_v21 }
  0x35   : > { %512 = vmatmul.mubr.bf16.gmra.mxu0 %v907_v22  ;;  %544 = vmatmul.mubr.bf16.gmra.mxu1 %v908_v23 }
  0x36   : > { %519 = vmatprep.mubr.bf16.mxu0 %v909_v24  ;;  %551 = vmatprep.mubr.bf16.mxu1 %v911_v25 }
  0x3d   : > { %520 = vmatmul.mubr.bf16.gmra.mxu0 %v913_v26  ;;  %552 = vmatmul.mubr.bf16.gmra.mxu1 %v914_v27 }
  0x3e   : > { %527 = vmatprep.mubr.bf16.mxu0 %v915_v28  ;;  %559 = vmatprep.mubr.bf16.mxu1 %v917_v29 }
  0x45   : > { %528 = vmatmul.mubr.bf16.gmra.mxu0 %v919_v30  ;;  %560 = vmatmul.mubr.bf16.gmra.mxu1 %v920_v31 }
  0xed   : > { %v793_v32 = vpop.f32.mrf.mxu0  ;;  %v817_v33 = vpop.f32.mrf.mxu1 }
  0xef   : > { %v794_v34 = vpop.f32.mrf.mxu0  ;;  %v818_v36 = vpop.f32.mrf.mxu1 }
  0xf0   : > { %v795_v37 = vadd.f32 %v794_v34, %v793_v32  ;;  %v819_v38 = vadd.f32 %v818_v36, %v817_v33 }
  0xf1   : > { %v796_v39 = vpop.f32.mrf.mxu0  ;;  %v820_v40 = vpop.f32.mrf.mxu1 }
  0xf2   : > { %v626_v41 = vadd.f32 %v795_v37, %v1060_v35  ;;  %v634_v42 = vadd.f32 %v819_v38, %v1060_v35 }
  0xf3   : > { %v797_v43 = vpop.f32.mrf.mxu0  ;;  %v821_v44 = vpop.f32.mrf.mxu1 }
  0xf4   : > { %642 = vst [vmem:[%s1067_s8] sm:$0xff] %v626_v41  ;;  %650 = vst [vmem:[%s1067_s8 + $0x40] sm:$0xff] %v634_v42  ;;  %v798_v45 = vadd.f32 %v797_v43, %v796_v39  ;;  %v822_v46 = vadd.f32 %v821_v44, %v820_v40 }
  0xf5   : > { %v799_v47 = vpop.f32.mrf.mxu0  ;;  %v823_v48 = vpop.f32.mrf.mxu1 }
  0xf6   : > { %v627_v49 = vadd.f32 %v798_v45, %v1060_v35  ;;  %v635_v50 = vadd.f32 %v822_v46, %v1060_v35 }
  0xf7   : > { %v800_v51 = vpop.f32.mrf.mxu0  ;;  %v824_v52 = vpop.f32.mrf.mxu1 }
  0xf8   : > { %643 = vst [vmem:[%s1067_s8 + $0x8] sm:$0xff] %v627_v49  ;;  %651 = vst [vmem:[%s1067_s8 + $0x48] sm:$0xff] %v635_v50  ;;  %v801_v53 = vadd.f32 %v800_v51, %v799_v47  ;;  %v825_v54 = vadd.f32 %v824_v52, %v823_v48 }
  0xf9   : > { %v802_v55 = vpop.f32.mrf.mxu0  ;;  %v826_v56 = vpop.f32.mrf.mxu1 }
  0xfa   : > { %v628_v57 = vadd.f32 %v801_v53, %v1060_v35  ;;  %v636_v58 = vadd.f32 %v825_v54, %v1060_v35 }
  0xfb   : > { %v803_v59 = vpop.f32.mrf.mxu0  ;;  %v827_v60 = vpop.f32.mrf.mxu1 }
  0xfc   : > { %644 = vst [vmem:[%s1067_s8 + $0x10] sm:$0xff] %v628_v57  ;;  %652 = vst [vmem:[%s1067_s8 + $0x50] sm:$0xff] %v636_v58  ;;  %v804_v61 = vadd.f32 %v803_v59, %v802_v55  ;;  %v828_v62 = vadd.f32 %v827_v60, %v826_v56 }
  0xfd   : > { %v805_v63 = vpop.f32.mrf.mxu0  ;;  %v829_v0 = vpop.f32.mrf.mxu1 }
  0xfe   : > { %v629_v1 = vadd.f32 %v804_v61, %v1060_v35  ;;  %v637_v2 = vadd.f32 %v828_v62, %v1060_v35 }
  0xff   : > { %v806_v3 = vpop.f32.mrf.mxu0  ;;  %v830_v4 = vpop.f32.mrf.mxu1 }
 0x100   : > { %645 = vst [vmem:[%s1067_s8 + $0x18] sm:$0xff] %v629_v1  ;;  %653 = vst [vmem:[%s1067_s8 + $0x58] sm:$0xff] %v637_v2  ;;  %v807_v5 = vadd.f32 %v806_v3, %v805_v63  ;;  %v831_v6 = vadd.f32 %v830_v4, %v829_v0 }
 0x101   : > { %v808_v7 = vpop.f32.mrf.mxu0  ;;  %v832_v8 = vpop.f32.mrf.mxu1 }
 0x102   : > { %v630_v9 = vadd.f32 %v807_v5, %v1060_v35  ;;  %v638_v10 = vadd.f32 %v831_v6, %v1060_v35 }
 0x103   : > { %v809_v11 = vpop.f32.mrf.mxu0  ;;  %v833_v12 = vpop.f32.mrf.mxu1 }
 0x104   : > { %646 = vst [vmem:[%s1067_s8 + $0x20] sm:$0xff] %v630_v9  ;;  %654 = vst [vmem:[%s1067_s8 + $0x60] sm:$0xff] %v638_v10  ;;  %v810_v13 = vadd.f32 %v809_v11, %v808_v7  ;;  %v834_v14 = vadd.f32 %v833_v12, %v832_v8 }
 0x105   : > { %v811_v15 = vpop.f32.mrf.mxu0  ;;  %v835_v16 = vpop.f32.mrf.mxu1 }
 0x106   : > { %v631_v17 = vadd.f32 %v810_v13, %v1060_v35  ;;  %v639_v18 = vadd.f32 %v834_v14, %v1060_v35 }
 0x107   : > { %v812_v19 = vpop.f32.mrf.mxu0  ;;  %v836_v20 = vpop.f32.mrf.mxu1 }
 0x108   : > { %647 = vst [vmem:[%s1067_s8 + $0x28] sm:$0xff] %v631_v17  ;;  %655 = vst [vmem:[%s1067_s8 + $0x68] sm:$0xff] %v639_v18  ;;  %v813_v21 = vadd.f32 %v812_v19, %v811_v15  ;;  %v837_v22 = vadd.f32 %v836_v20, %v835_v16 }
 0x109   : > { %v814_v23 = vpop.f32.mrf.mxu0  ;;  %v838_v24 = vpop.f32.mrf.mxu1 }
 0x10a   : > { %v632_v25 = vadd.f32 %v813_v21, %v1060_v35  ;;  %v640_v26 = vadd.f32 %v837_v22, %v1060_v35 }
 0x10b   : > { %v815_v27 = vpop.f32.mrf.mxu0  ;;  %v839_v28 = vpop.f32.mrf.mxu1 }
 0x10c   : > { %648 = vst [vmem:[%s1067_s8 + $0x30] sm:$0xff] %v632_v25  ;;  %656 = vst [vmem:[%s1067_s8 + $0x70] sm:$0xff] %v640_v26  ;;  %v816_v29 = vadd.f32 %v815_v27, %v814_v23  ;;  %v840_v30 = vadd.f32 %v839_v28, %v838_v24 }
 0x10e   : > { %v633_v31 = vadd.f32 %v816_v29, %v1060_v35  ;;  %v641_v32 = vadd.f32 %v840_v30, %v1060_v35 }
 0x110   : > { %649 = vst [vmem:[%s1067_s8 + $0x38] sm:$0xff] %v633_v31  ;;  %657 = vst [vmem:[%s1067_s8 + $0x78] sm:$0xff] %v641_v32 }
 0x111 PF: > { %s13_s14 = sadd.s32 1, %s943_s14   ;;  %s1114_s12 = smov %s939_s13 }
 0x112   : > { %p10_p5 = scmp.ge.s32.totalorder %s13_s14, 4   ;;  %s1115_s13 = smov %s1117_s15 }
 0x114   :  { %12 = sbr.rel (!%p10_p5) target bundleno = 2 (0x2), region = 71 }

</bundles_post_ra>
